<compile_context>
chip_gen: v6e
topology: v6e:2x2x1
jax: 0.10.0
libtpu: 0.0.40
codegen_flags: <defaults>
</compile_context>

<pallas_src>
import functools

import jax
import jax.numpy as jnp
from jax.experimental import pallas as pl
from jax.experimental.pallas import tpu as pltpu

_LANE = 128     # lane width (last dim granularity)
_SUBLANE = 8    # sublane granularity (second-to-last dim, f32)


def _round_up(n, m):
    return ((n + m - 1) // m) * m


def _conv_transform_kernel(x_ref, w1_ref, b1_ref, w2_ref, b2_ref, o_ref,
                           *, use_bf16=False):
    # x_ref:  (TM, C)    f32   row tile of the flattened input (unpadded lanes)
    # w1_ref: (C, Hp)          conv1 weight (transposed, hidden lane-padded)
    # b1_ref: (1, Hp)
    # w2_ref: (Hp, O)          conv2 weight (transposed)
    # b2_ref: (1, O)
    # o_ref:  (TM, O)
    x = x_ref[...]
    w1 = w1_ref[...]
    w2 = w2_ref[...]
    if use_bf16:
        x = x.astype(jnp.bfloat16)
        w1 = w1.astype(jnp.bfloat16)
        w2 = w2.astype(jnp.bfloat16)
    h = jnp.dot(x, w1, preferred_element_type=jnp.float32)
    h = jnp.maximum(h + b1_ref[...], 0.0)             # F.relu_
    if use_bf16:
        h = h.astype(jnp.bfloat16)
    y = jnp.dot(h, w2, preferred_element_type=jnp.float32)
    o_ref[...] = (y + b2_ref[...]).astype(o_ref.dtype)


def _choose_tm(M, tm_target, min_tiles):
    """Row tile: multiple of 8, capped at tm_target, >= min_tiles grid steps."""
    if M <= _SUBLANE:
        # Full-dim block (legal even when < 8 rows); grid of 1.
        return M
    tm = _round_up(pl.cdiv(M, min_tiles), _SUBLANE)
    tm = max(min(tm, tm_target), _SUBLANE)
    return tm


def conv_transform_pallas(x_flat, w1_t, b1, w2_t, b2, *,
                          tm_target=2048, min_tiles=8, use_bf16=False):
    """x_flat: (M, in_dim) f32; returns (M, out_dim) — no HBM-side padding."""
    M, C = x_flat.shape
    Hp = w1_t.shape[1]
    O = w2_t.shape[1]
    assert w1_t.shape[0] == C and w2_t.shape[0] == Hp and b1.shape == (1, Hp)
    assert b2.shape == (1, O)
    assert tm_target % _SUBLANE == 0, "tm_target must be a multiple of 8"

    TM = _choose_tm(M, tm_target, min_tiles)
    assert TM == M or TM % _SUBLANE == 0
    grid = (pl.cdiv(M, TM),)   # ragged last tile handled by Pallas OOB masking

    # True (unpadded) HBM footprint.
    cost = pl.CostEstimate(
        flops=2 * M * (C * Hp + Hp * O),
        transcendentals=0,
        bytes_accessed=4 * (M * C + M * O + C * Hp + Hp + Hp * O + O),
    )

    kernel = functools.partial(_conv_transform_kernel, use_bf16=use_bf16)

    # VMEM per step at demo widths: 2 x (TM*C + TM*O) * 4B double-buffered
    # tiles + ~80 KiB resident weights — far below the scoped default on
    # v5e/v6e/v7x.  (Pipeline depth left at default; pl.Buffered tuning only
    # pays off if a profile shows exposed DMA.)
    return pl.pallas_call(
        kernel,
        out_shape=jax.ShapeDtypeStruct((M, O), x_flat.dtype),
        grid=grid,
        in_specs=[
            pl.BlockSpec((TM, C), lambda i: (i, 0)),   # row-tiled input
            pl.BlockSpec((C, Hp), lambda i: (0, 0)),   # weights: VMEM-resident
            pl.BlockSpec((1, Hp), lambda i: (0, 0)),
            pl.BlockSpec((Hp, O), lambda i: (0, 0)),
            pl.BlockSpec((1, O), lambda i: (0, 0)),
        ],
        out_specs=pl.BlockSpec((TM, O), lambda i: (i, 0)),
        compiler_params=pltpu.CompilerParams(
            dimension_semantics=("parallel",),   # shard row tiles across TCs (v7x)
        ),
        cost_estimate=cost,
    )(x_flat, w1_t, b1, w2_t, b2)


class ConvTransformJax:
    """JAX/Pallas port of antmmf ConvTransform (two 1x1 Conv2d + ReLU)."""

    def __init__(self, in_dim, out_dim, hidden_dim, key, use_bf16_matmul=False):
        self.in_dim = in_dim
        self.out_dim = out_dim
        self.hidden_dim = hidden_dim
        self.use_bf16_matmul = use_bf16_matmul

        # Only the intermediate (hidden) axis is lane-padded — it never
        # touches HBM per-row, and padding the tiny weights is free & exact.
        self.hid_p = _round_up(hidden_dim, _LANE)

        k1, k2, k3, k4 = jax.random.split(key, 4)
        # Conv2d(k=1) weight shape is (out_ch, in_ch, 1, 1) -> store transposed
        # (in_ch, out_ch) for the matmul form.  Deterministic init.
        s1 = 1.0 / jnp.sqrt(in_dim)
        s2 = 1.0 / jnp.sqrt(hidden_dim)
        self.w1_t = jax.random.uniform(k1, (in_dim, hidden_dim), jnp.float32, -s1, s1)
        self.b1 = jax.random.uniform(k2, (1, hidden_dim), jnp.float32, -s1, s1)
        self.w2_t = jax.random.uniform(k3, (hidden_dim, out_dim), jnp.float32, -s2, s2)
        self.b2 = jax.random.uniform(k4, (1, out_dim), jnp.float32, -s2, s2)

        # Zero-pad hidden axis once at init (exact: padded cols of W1/b1 give
        # relu(0)=0 and padded rows of W2 are 0, contributing nothing).
        self.w1_tp = jnp.pad(self.w1_t, ((0, 0), (0, self.hid_p - hidden_dim)))
        self.b1p = jnp.pad(self.b1, ((0, 0), (0, self.hid_p - hidden_dim)))
        self.w2_tp = jnp.pad(self.w2_t, ((0, self.hid_p - hidden_dim), (0, 0)))
        self.b2p = self.b2

    def _apply_flat(self, x_flat):
        # No lane/row padding of x and no output slicing — the kernel streams
        # the logical (M, in_dim) / (M, out_dim) tensors directly.
        return conv_transform_pallas(
            x_flat.astype(jnp.float32),
            self.w1_tp, self.b1p, self.w2_tp, self.b2p,
            use_bf16=self.use_bf16_matmul)

    def __call__(self, x):
        if x.ndim == 3:
            # (B, S, in_dim): 1x1 conv acts independently at each (b, s).
            B, S, C = x.shape
            assert C == self.in_dim
            y_flat = self._apply_flat(x.reshape(B * S, C))
            return y_flat.reshape(B, S, self.out_dim)
        elif x.ndim == 2:
            # (B, in_dim) -> (B, out_dim)
            assert x.shape[1] == self.in_dim
            return self._apply_flat(x)
        else:
            raise NotImplementedError(
                f"invalid input with shape of {x.shape}, only 2d and 3d tensor "
                f"are available.")


def _reference(x, w1_t, b1, w2_t, b2):
    h = jnp.maximum(x @ w1_t + b1, 0.0)
    return h @ w2_t + b2


if __name__ == "__main__":
    key = jax.random.PRNGKey(0)
    k_param, k_x3, k_x2, k_xr = jax.random.split(key, 4)

    in_dim, out_dim, hidden_dim = 32, 16, 64
    B, S = 2, 8

    mod = ConvTransformJax(in_dim, out_dim, hidden_dim, k_param)

    # 3-D input case: (B, S, in_dim) -> M = 16 rows, two row tiles.
    x3 = jax.random.normal(k_x3, (B, S, in_dim), jnp.float32)
    y3 = mod(x3)
    jax.block_until_ready(y3)
    ref3 = _reference(x3.reshape(B * S, in_dim), mod.w1_t, mod.b1,
                      mod.w2_t, mod.b2).reshape(B, S, out_dim)
    assert y3.shape == (B, S, out_dim)
    assert jnp.allclose(y3, ref3, atol=1e-5, rtol=1e-5)

    # 2-D input case: (B, in_dim) — tiny M, single full-dim block.
    x2 = jax.random.normal(k_x2, (B, in_dim), jnp.float32)
    y2 = mod(x2)
    jax.block_until_ready(y2)
    ref2 = _reference(x2, mod.w1_t, mod.b1, mod.w2_t, mod.b2)
    assert y2.shape == (B, out_dim)
    assert jnp.allclose(y2, ref2, atol=1e-5, rtol=1e-5)

    # 2-D ragged case: M = 10 not a multiple of the row tile — exercises the
    # OOB-masked last grid tile.
    xr = jax.random.normal(k_xr, (10, in_dim), jnp.float32)
    yr = mod(xr)
    jax.block_until_ready(yr)
    refr = _reference(xr, mod.w1_t, mod.b1, mod.w2_t, mod.b2)
    assert yr.shape == (10, out_dim)
    assert jnp.allclose(yr, refr, atol=1e-5, rtol=1e-5)

    print("KERNEL_OK")
</pallas_src>

<mosaic_0001>
module attributes {stable_mosaic.version = 11 : i64} {
  func.func @_conv_transform_kernel(%arg0: i32, %arg1: memref<8x32xf32, #tpu.memory_space<vmem>>, %arg2: memref<32x128xf32, #tpu.memory_space<vmem>>, %arg3: memref<1x128xf32, #tpu.memory_space<vmem>>, %arg4: memref<128x16xf32, #tpu.memory_space<vmem>>, %arg5: memref<1x16xf32, #tpu.memory_space<vmem>>, %arg6: memref<8x16xf32, #tpu.memory_space<vmem>>) attributes {dimension_semantics = [#tpu.dimension_semantics<parallel>], iteration_bounds = array<i64: 2>, scalar_prefetch = 0 : i64, scratch_operands = 0 : i64, tpu.core_type = #tpu.core_type<tc>, window_params = [{transform_indices = @transform_0, window_bounds = array<i64: 8, 32>}, {pipeline_mode = #tpu.pipeline_mode<synchronous>, transform_indices = @transform_1, window_bounds = array<i64: 32, 128>}, {pipeline_mode = #tpu.pipeline_mode<synchronous>, transform_indices = @transform_2, window_bounds = array<i64: 1, 128>}, {pipeline_mode = #tpu.pipeline_mode<synchronous>, transform_indices = @transform_3, window_bounds = array<i64: 128, 16>}, {pipeline_mode = #tpu.pipeline_mode<synchronous>, transform_indices = @transform_4, window_bounds = array<i64: 1, 16>}, {transform_indices = @transform_5, window_bounds = array<i64: 8, 16>}]} {
    %c0 = arith.constant 0 : index
    %c0_0 = arith.constant 0 : index
    %0 = vector.load %arg1[%c0, %c0_0] : memref<8x32xf32, #tpu.memory_space<vmem>>, vector<8x32xf32>
    %c0_1 = arith.constant 0 : index
    %c0_2 = arith.constant 0 : index
    %1 = vector.load %arg2[%c0_1, %c0_2] : memref<32x128xf32, #tpu.memory_space<vmem>>, vector<32x128xf32>
    %c0_3 = arith.constant 0 : index
    %c0_4 = arith.constant 0 : index
    %2 = vector.load %arg4[%c0_3, %c0_4] : memref<128x16xf32, #tpu.memory_space<vmem>>, vector<128x16xf32>
    %cst = arith.constant dense<0.000000e+00> : vector<8x128xf32>
    %3 = tpu.matmul %0, %1, %cst {dimension_numbers = #tpu.dot_dimension_numbers<[1], [0], [0], [1], [0, 0, 1, 1], [], []>} : vector<8x32xf32>, vector<32x128xf32>, vector<8x128xf32> -> vector<8x128xf32>
    %c0_5 = arith.constant 0 : index
    %c0_6 = arith.constant 0 : index
    %4 = vector.load %arg3[%c0_5, %c0_6] : memref<1x128xf32, #tpu.memory_space<vmem>>, vector<1x128xf32>
    %5 = vector.broadcast %4 : vector<1x128xf32> to vector<8x128xf32>
    %6 = arith.addf %3, %5 : vector<8x128xf32>
    %cst_7 = arith.constant 0.000000e+00 : f32
    %7 = vector.broadcast %cst_7 : f32 to vector<8x128xf32>
    %8 = arith.maximumf %6, %7 : vector<8x128xf32>
    %cst_8 = arith.constant dense<0.000000e+00> : vector<8x16xf32>
    %9 = tpu.matmul %8, %2, %cst_8 {dimension_numbers = #tpu.dot_dimension_numbers<[1], [0], [0], [1], [0, 0, 1, 1], [], []>} : vector<8x128xf32>, vector<128x16xf32>, vector<8x16xf32> -> vector<8x16xf32>
    %c0_9 = arith.constant 0 : index
    %c0_10 = arith.constant 0 : index
    %10 = vector.load %arg5[%c0_9, %c0_10] : memref<1x16xf32, #tpu.memory_space<vmem>>, vector<1x16xf32>
    %11 = vector.broadcast %10 : vector<1x16xf32> to vector<8x16xf32>
    %12 = arith.addf %9, %11 : vector<8x16xf32>
    %c0_11 = arith.constant 0 : index
    %c0_12 = arith.constant 0 : index
    %13 = vector.load %arg6[%c0_11, %c0_12] : memref<8x16xf32, #tpu.memory_space<vmem>>, vector<8x16xf32>
    tpu.vector_store %arg6[%c0_11, %c0_12], %12 {strides = array<i32>} : memref<8x16xf32, #tpu.memory_space<vmem>>, vector<8x16xf32>,
    return
  }
  func.func @transform_0(%arg0: i32) -> (i32, i32) {
    %c0_i32 = arith.constant 0 : i32
    %c0_i32_0 = arith.constant 0 : i32
    return %arg0, %c0_i32 : i32, i32
  }
  func.func @transform_1(%arg0: i32) -> (i32, i32) {
    %c0_i32 = arith.constant 0 : i32
    %c0_i32_0 = arith.constant 0 : i32
    %c0_i32_1 = arith.constant 0 : i32
    return %c0_i32, %c0_i32_0 : i32, i32
  }
  func.func @transform_2(%arg0: i32) -> (i32, i32) {
    %c0_i32 = arith.constant 0 : i32
    %c0_i32_0 = arith.constant 0 : i32
    %c0_i32_1 = arith.constant 0 : i32
    return %c0_i32, %c0_i32_0 : i32, i32
  }
  func.func @transform_3(%arg0: i32) -> (i32, i32) {
    %c0_i32 = arith.constant 0 : i32
    %c0_i32_0 = arith.constant 0 : i32
    %c0_i32_1 = arith.constant 0 : i32
    return %c0_i32, %c0_i32_0 : i32, i32
  }
  func.func @transform_4(%arg0: i32) -> (i32, i32) {
    %c0_i32 = arith.constant 0 : i32
    %c0_i32_0 = arith.constant 0 : i32
    %c0_i32_1 = arith.constant 0 : i32
    return %c0_i32, %c0_i32_0 : i32, i32
  }
  func.func @transform_5(%arg0: i32) -> (i32, i32) {
    %c0_i32 = arith.constant 0 : i32
    %c0_i32_0 = arith.constant 0 : i32
    return %arg0, %c0_i32 : i32, i32
  }
}

</mosaic_0001>

<bundles_post_ra>
// kernel: tpu_custom_call.1
= control target key start
LH: loop header
LB: loop body
LE: loop exit
PB: predicated region body
PF: predicated region fallthrough
CT: control target
= control target key end

     0   :  { %10 = vsyncpa [#allocation3], 0  ;;  %s875_s0 = inlined_call_operand.vmem [shape: f32[16,32], index: 0, kind: input, shape index: {}]   ;;  %s876_s1 = inlined_call_operand.vmem [shape: f32[32,128], index: 1, kind: input, shape index: {}]   ;;  %s877_s2 = inlined_call_operand.vmem [shape: f32[1,128], index: 2, kind: input, shape index: {}]   ;;  %s878_s3 = inlined_call_operand.vmem [shape: f32[128,16], index: 3, kind: input, shape index: {}]   ;;  %s879_s4 = inlined_call_operand.vmem [shape: f32[1,16], index: 4, kind: input, shape index: {}]   ;;  %s880_s5 = inlined_call_operand.hbm [shape: f32[16,16], index: 5, kind: output, shape index: {}]  }
   0x1   :  { %12 = vsyncpa [#allocation3 + $0x1], 0  ;;  %s692_s18 = smov 0   ;;  %s694_s19 = smov 0  }
   0x2   :  { %s696_s20 = smov 0   ;;  %s698_s21 = smov 0  }
   0x3 LB: > { %s713_s22 = sadd.s32 4294967295, %s657_s21   ;;  %s475_s23 = sadd.s32 4294967294, %s657_s21   ;;  %s657_s21 = sphi %s698_s21, %s886_s21   ;;  %s653_s20 = sphi %s696_s20, %s885_s20   ;;  %s649_s19 = sphi %s694_s19, %s884_s19   ;;  %s645_s18 = sphi %s692_s18, %s883_s18  }
   0x4   : > { %s717_s24 = sadd.s32 1, %s657_s21   ;;  %s135_s25 = sadd.s32 1, %s653_s20 }
   0x5   : > { %s132_s26 = ssub.s32 %s657_s21, %s717_s24  ;;  %p145_p0 = scmp.ne.s32.totalorder %s653_s20, %s649_s19 }
   0x6   : > { %p133_p1 = scmp.eq.s32.totalorder %s132_s26, 0  ;;  %p146_p2 = scmp.eq.s32.totalorder %s713_s22, 1 }
   0x7   : > { %p151_p3 = scmp.ne.s32.totalorder %s649_s19, %s645_s18  ;;  %p152_p4 = scmp.eq.s32.totalorder %s475_s23, 1 }
   0x8   : > { %s728_s27 = scalar_select %p133_p1, %s653_s20, %s135_s25  }
   0x9   : > { %p730_p5 = por %p146_p2, %p145_p0  ;;  %p734_p6 = por %p152_p4, %p151_p3 }
   0xa   : > { %p478_p7 = scmp.ge.s32.totalorder %s657_s21, 1  ;;  %p189_p8 = scmp.lt.s32.totalorder %s657_s21, 3 }
   0xc   : > { %p190_p9 = pnand %p478_p7, %p189_p8 }
   0xd   : > { %p216_p10 = scmp.lt.s32.totalorder (!%p190_p9), %s713_s22, 1  ;;  %s213_s26 = sand.u32 (!%p190_p9), 1, %s649_s19  }
   0xe   : > { %193 = sbr.rel (%p190_p9) target bundleno = 433 (0x1b1), region = 40  ;;  %s479_s30 = sshll.u32 (!%p190_p9), %s213_s26, 3 }
   0xf   : > { %s485_s8 = sshll.u32 (!%p190_p9), %s713_s22, 7  ;;  %s215_s9 = scalar_lea.vmem (!%p190_p9), [#allocation2], %s479_s30 }
  0x10   : > { %s416_s10 = sshll.u32 (!%p190_p9), %s215_s9, 4  ;;  %s840_s13 = scalar_lea.hbm (!%p190_p9), %s880_s5, %s485_s8  ;;  %s417_s10 = int_to_ptr.vmem [resolvable:$true] %s416_s10 }
  0x11   : > { %s403_s14 = scalar_lea.sflag (!%p190_p9), [#allocation3], %s213_s26  ;;  %s597_s15 = scalar_lea.vmem (!%p190_p9), %s417_s10, 128 }
  0x12   : > { %p598_p11 = scmp.ne.s32.totalorder (!%p190_p9), %s417_s10, %s597_s15 }
  0x13   : > { %v224_v0 = vld [vmem:[%s876_s1 + $0x18] sm:$0xff]  ;;  %v659_v1 = vmov 0.0   ;;  %v223_v2 = vld [vmem:[%s876_s1 + $0x10] sm:$0xff]  ;;  %vm660_vm0 = vmmov 0   ;;  %s217_s11 = scalar_select %p216_p10, %s713_s22, 1  ;;  %v222_v5 = vld [vmem:[%s876_s1 + $0x8] sm:$0xff] }
  0x14   : > { %510 = vmatprep.subr.mxu0 %v659_v1  ;;  %518 = vmatprep.mubr.msk.f32.mxu0 %vm660_vm0, %v659_v1  ;;  %v240_v3 = vld [vmem:[%s878_s3 + $0x78] sm:$0xff]  ;;  %v239_v4 = vld [vmem:[%s878_s3 + $0x70] sm:$0xff]  ;;  %v238_v6 = vld [vmem:[%s878_s3 + $0x68] sm:$0xff]  ;;  %vm248_vm1 = vcmask 261120   ;;  %vm400_vm2 = vcmask 130048   ;;  %p599_p12 = pnand %p598_p11, %p730_p5  ;;  %s661_s22 = smov [#allocation2]  }
  0x15   : > { %511 = vmatpush3.msra.mxu0 %v224_v0  ;;  %521 = vmatprep.subr.mxu1 %v659_v1  ;;  %s480_s16 = sshll.u32 %s217_s11, 3  ;;  %v221_v7 = vld [vmem:[%s876_s1] sm:$0xff]  ;;  %v236_v10 = vld [vmem:[%s878_s3 + $0x58] sm:$0xff]  ;;  %v235_v11 = vld [vmem:[%s878_s3 + $0x50] sm:$0xff] }
  0x16   : > { %512 = vmatprep.subr.mxu0 %v659_v1  ;;  %522 = vmatpush3.msra.mxu1 %v240_v3  ;;  %s219_s7 = scalar_lea.vmem %s875_s0, %s480_s16  ;;  %v237_v9 = vld [vmem:[%s878_s3 + $0x60] sm:$0xff]  ;;  %v234_v12 = vld [vmem:[%s878_s3 + $0x48] sm:$0xff]  ;;  %v232_v14 = vld [vmem:[%s878_s3 + $0x38] sm:$0xff]  ;;  %p600_p13 = pneg %p599_p12 }
  0x17   : > { %513 = vmatpush3.msra.mxu0 %v223_v2  ;;  %523 = vmatprep.subr.mxu1 %v659_v1  ;;  %v220_v8 = vld [vmem:[%s219_s7] sm:$0xff]  ;;  %v231_v15 = vld [vmem:[%s878_s3 + $0x30] sm:$0xff]  ;;  %v230_v16 = vld [vmem:[%s878_s3 + $0x28] sm:$0xff]  ;;  %s601_s16 = sshll.u32 %s661_s22, 4  ;;  %s602_s16 = int_to_ptr.vmem [resolvable:$false] %s601_s16 }
  0x18   : > { %514 = vmatprep.subr.mxu0 %v659_v1  ;;  %524 = vmatpush3.msra.mxu1 %v239_v4  ;;  %v233_v13 = vld [vmem:[%s878_s3 + $0x40] sm:$0xff]  ;;  %v228_v18 = vld [vmem:[%s878_s3 + $0x18] sm:$0xff]  ;;  %v227_v19 = vld [vmem:[%s878_s3 + $0x10] sm:$0xff]  ;;  %s603_s17 = scalar_lea.vmem %s602_s16, 256  ;;  %p604_p0 = scmp.lt.s32.totalorder %s417_s10, %s602_s16 }
  0x19   : > { %515 = vmatpush3.msra.mxu0 %v222_v5  ;;  %525 = vmatprep.subr.mxu1 %v659_v1  ;;  %v229_v17 = vld [vmem:[%s878_s3 + $0x20] sm:$0xff]  ;;  %v226_v20 = vld [vmem:[%s878_s3 + $0x8] sm:$0xff]  ;;  %p605_p1 = scmp.lt.s32.totalorder %s603_s17, %s597_s15 }
  0x1a   : > { %516 = vmatprep.subr.mxu0 %v659_v1  ;;  %526 = vmatpush3.msra.mxu1 %v238_v6  ;;  %v225_v21 = vld [vmem:[%s878_s3] sm:$0xff] }
  0x1b   : > { %517 = vmatpush3.msra.mxu0 %v221_v7  ;;  %527 = vmatprep.subr.mxu1 %v659_v1  ;;  %v481_v22 = vld [vmem:[%s877_s2] ss:$0 sm:$0xff]  ;;  %p606_p2 = por %p605_p1, %p604_p0 }
  0x1c   : > { %519 = vmatmul.mubr.msk.f32.vlgmr.msra.gmra.mxu0 %vm248_vm1, %v220_v8  ;;  %528 = vmatpush3.msra.mxu1 %v237_v9  ;;  %v483_v27 = vld [vmem:[%s879_s4] ss:$0 sm:$0xff] }
  0x1d   : > { %529 = vmatprep.subr.mxu1 %v659_v1  ;;  %553 = vmatprep.mubr.msk.f32.mxu1 %vm660_vm0, %v659_v1  ;;  %p607_p3 = pnand %p606_p2, %p600_p13 }
  0x1e   : > { %530 = vmatpush3.msra.mxu1 %v236_v10 }
  0x1f   : > { %531 = vmatprep.subr.mxu1 %v659_v1 }
  0x20   : > { %532 = vmatpush3.msra.mxu1 %v235_v11 }
  0x21   : > { %533 = vmatprep.subr.mxu1 %v659_v1 }
  0x22   : > { %534 = vmatpush3.msra.mxu1 %v234_v12 }
  0x23   : > { %535 = vmatprep.subr.mxu1 %v659_v1 }
  0x24   : > { %536 = vmatpush3.msra.mxu1 %v233_v13 }
  0x25   : > { %537 = vmatprep.subr.mxu1 %v659_v1 }
  0x26   : > { %538 = vmatpush3.msra.mxu1 %v232_v14 }
  0x27   : > { %539 = vmatprep.subr.mxu1 %v659_v1 }
  0x28   : > { %540 = vmatpush3.msra.mxu1 %v231_v15 }
  0x29   : > { %541 = vmatprep.subr.mxu1 %v659_v1 }
  0x2a   : > { %542 = vmatpush3.msra.mxu1 %v230_v16 }
  0x2b   : > { %543 = vmatprep.subr.mxu1 %v659_v1 }
  0x2c   : > { %544 = vmatpush3.msra.mxu1 %v229_v17 }
  0x2d   : > { %545 = vmatprep.subr.mxu1 %v659_v1 }
  0x2e   : > { %546 = vmatpush3.msra.mxu1 %v228_v18 }
  0x2f   : > { %547 = vmatprep.subr.mxu1 %v659_v1 }
  0x30   : > { %548 = vmatpush3.msra.mxu1 %v227_v19 }
  0x31   : > { %549 = vmatprep.subr.mxu1 %v659_v1 }
  0x32   : > { %550 = vmatpush3.msra.mxu1 %v226_v20 }
  0x33   : > { %551 = vmatprep.subr.mxu1 %v659_v1 }
  0x34   : > { %552 = vmatpush3.msra.mxu1 %v225_v21 }
  0xdc   : > { %v318_v23 = vpop.f32.mrf.mxu0 }
  0xdd   : > { %v319_v24 = vadd.f32 %v481_v22, %v318_v23 }
  0xde   : > { %v520_v25 = vpop.f32.mrf.mxu0 }
  0xdf   : > { %v322_v26 = vmax.f32 %v319_v24, 0.0 }
  0xe1   : > { %554 = vmatmul.mubr.f32.vlgmr.msra.gmra.mxu1 %v322_v26 }
 0x1a1   : > { %v396_v28 = vpop.f32.mrf.mxu1 }
 0x1a2   : > { %v397_v29 = vadd.f32 %v483_v27, %v396_v28 }
 0x1a3   : > { %v555_v30 = vpop.f32.mrf.mxu1 }
 0x1a4   : > { %401 = vst.msk [vmem:[%s215_s9] sm:$0xff] %vm400_vm2, %v397_v29 }
 0x1a5   : > { %610 = shalt.err (!%p607_p3)
}
 0x1a6   : > { %s611_s23 = scalar_lea.hbm %s840_s13, 128  ;;  %s615_s30 = scalar_lea.hbm %s880_s5, 256 }
 0x1a7   : > { %p612_p4 = scmp.ne.s32.totalorder %s840_s13, %s611_s23  ;;  %p616_p9 = scmp.lt.s32.totalorder %s840_s13, %s880_s5 }
 0x1a8   : > { %p617_p10 = scmp.lt.s32.totalorder %s615_s30, %s611_s23 }
 0x1a9   : > { %p613_p7 = pnand %p612_p4, %p730_p5 }
 0x1aa   : > { %p618_p11 = por %p617_p10, %p616_p9 }
 0x1ab   : > { %p614_p8 = pneg %p613_p7 }
 0x1ad   : > { %p619_p12 = pnand %p618_p11, %p614_p8 }
 0x1af   : > { %622 = shalt.err (!%p619_p12)
}
 0x1b0   : > { %556 = dma.vmem_to_hbm [thread:$0]  (%p730_p5), %s417_s10, 128, %s840_s13, %s403_s14  }
 0x1b1 PF: > { %p562_p13 = scmp.ge.s32.totalorder %s657_s21, 2  ;;  %s428_s8 = sand.u32 1, %s645_s18  }
 0x1b2   : > { %s429_s9 = scalar_lea.sflag [#allocation3], %s428_s8 }
 0x1b3   : > { %p559_p0 = pnand %p562_p13, %p734_p6 }
 0x1b5   : > { %p560_p1 = pneg %p559_p0 }
 0x1b7   : > { %640 = dma.done.wait (%p560_p1), %s429_s9, 128  }
 0x1b8   : > { %642 = vsyncadd (%p560_p1), %s429_s9, 4294967168  ;;  %p15_p2 = scmp.ge.s32.totalorder %s717_s24, 4   ;;  %s883_s18 = smov %s649_s19 }
 0x1b9   : > { %s884_s19 = smov %s653_s20  ;;  %s885_s20 = smov %s728_s27 }
 0x1ba   : > { %s886_s21 = smov %s717_s24  ;;  %17 = sbr.rel (!%p15_p2) target bundleno = 3 (0x3), region = 75 }
 0x1bf   :  { %434 = vsyncpa [#allocation3], 1 }
 0x1c0   :  { %436 = vsyncpa [#allocation3 + $0x1], 1 }

</bundles_post_ra>
